<compile_context>
chip_gen: v7x
topology: tpu7x:2x2x1
jax: 0.10.0
libtpu: 0.0.40
codegen_flags: <defaults>
</compile_context>

<pallas_src>
import jax
import jax.numpy as jnp
from jax.experimental import pallas as pl
from jax.experimental.pallas import tpu as pltpu


def _round_up(v, m):
    return -(-v // m) * m


def attn_model_kernel(x_ref, wd_ref, wl_ref, bl_ref, logp_ref, emb_ref):
    F = emb_ref.shape[-1]

    # Load the row tile once and upcast (no-op for f32 inputs).
    x = x_ref[...].astype(jnp.float32)          # (TM, 2F)
    # Lane-aligned split when F is a multiple of 128; still correct otherwise.
    x1 = x[:, :F]                                # (TM, F)
    x2 = x[:, F:]                                # (TM, F)

    # --- attention score difference d = s1 - s2 on the (idle) MXU:
    #     single (TM, 2F) @ (2F, 1) matmul against [w1; -w2].
    d = jnp.dot(x, wd_ref[...].astype(jnp.float32),
                preferred_element_type=jnp.float32)          # (TM, 1)

    # --- 2-element softmax gate == sigmoid(d); tanh form = one EUP push.
    a1 = 0.5 * (1.0 + jnp.tanh(0.5 * d))         # (TM, 1)

    # --- gated combination: a1*x1 + (1-a1)*x2 == x2 + a1*(x1 - x2)
    emb = x2 + a1 * (x1 - x2)                    # (TM, F)
    emb_ref[...] = emb.astype(emb_ref.dtype)

    # --- final Linear (with bias) + log_softmax over dim=1 ---
    logits = jnp.dot(emb, wl_ref[...].astype(jnp.float32),
                     preferred_element_type=jnp.float32)     # (TM, O)
    logits = logits + bl_ref[...].astype(jnp.float32)
    mx = jnp.max(logits, axis=-1, keepdims=True)
    z = logits - mx
    lse = jnp.log(jnp.sum(jnp.exp(z), axis=-1, keepdims=True))
    logp_ref[...] = (z - lse).astype(logp_ref.dtype)


def attn_model_forward(x, w_attn1, w_attn2, w_linear, b_linear, *,
                       tile_rows=4096):
    """x: (N, 2*in_feats); w_attn*: (1, in_feats);
    w_linear: (out_feats, in_feats); b_linear: (out_feats,)."""
    N, twoF = x.shape
    F = twoF // 2
    O = w_linear.shape[0]

    # Parameter packaging (trace-time):
    #   w_diff: (2F, 1) column so that x @ w_diff == s1 - s2.
    w_diff = jnp.concatenate([w_attn1[0], -w_attn2[0]]).reshape(twoF, 1)
    wl_t = w_linear.T                            # (F, O)  pre-transposed for MXU
    bl = b_linear.reshape(1, O)                  # (1, O)

    # --- tile-size selection -------------------------------------------------
    itemsize = jnp.dtype(x.dtype).itemsize
    # Double-buffered bytes per row: x in + emb out + lane-padded (.,128) logp.
    per_row = 2 * ((twoF + F) * itemsize + 128 * 4)

    TM = min(int(tile_rows), _round_up(N, 8))
    # Keep the streaming double-buffer footprint <= ~40 MiB (v7x physical VMEM
    # is 64 MiB per TensorCore; v5e/v6e have 128 MiB but smaller scoped defaults).
    TM = min(TM, max(8, ((40 << 20) // per_row) // 8 * 8))
    # v7x dual-TC load balance: keep >= 8 grid steps when N is large enough,
    # but never shrink tiles below 512 rows for it (per-step overhead ~0.35 us).
    if N >= 8 * 512:
        TM = min(TM, max(512, _round_up(-(-N // 8), 8)))
    TM = max(8, (TM // 8) * 8)

    num_tiles = pl.cdiv(N, TM)                   # partial last block handled by Pallas
    vmem_limit = int(per_row * TM) + (8 << 20)   # streaming bufs + weights + headroom

    logp, emb = pl.pallas_call(
        attn_model_kernel,
        out_shape=(
            jax.ShapeDtypeStruct((N, O), jnp.float32),   # log-probs in f32
            jax.ShapeDtypeStruct((N, F), x.dtype),       # embeddings in x.dtype
        ),
        grid=(num_tiles,),
        in_specs=[
            pl.BlockSpec((TM, twoF), lambda i: (i, 0)),  # x row tile (streamed)
            pl.BlockSpec((twoF, 1),  lambda i: (0, 0)),  # [w1; -w2] (resident)
            pl.BlockSpec((F, O),     lambda i: (0, 0)),  # linear weight^T (resident)
            pl.BlockSpec((1, O),     lambda i: (0, 0)),  # linear bias (resident)
        ],
        out_specs=(
            pl.BlockSpec((TM, O), lambda i: (i, 0)),
            pl.BlockSpec((TM, F), lambda i: (i, 0)),
        ),
        compiler_params=pltpu.CompilerParams(
            dimension_semantics=("parallel",),           # dual-TC on v7x
            vmem_limit_bytes=vmem_limit),
    )(x, w_diff, wl_t, bl)

    return logp, emb


def reference_forward(x, w_attn1, w_attn2, w_linear, b_linear):
    """Pure-JAX reference mirroring the PyTorch module."""
    F = x.shape[1] // 2
    x1, x2 = x[:, :F], x[:, F:]
    s1 = x1 @ w_attn1.T
    s2 = x2 @ w_attn2.T
    attn = jax.nn.softmax(jnp.concatenate([s1, s2], axis=1), axis=1)
    a1 = attn[:, 0:1]
    a2 = attn[:, 1:2]
    emb = a1 * x1 + a2 * x2
    logits = emb @ w_linear.T + b_linear
    return jax.nn.log_softmax(logits, axis=1), emb


if __name__ == "__main__":
    key = jax.random.PRNGKey(0)
    kx, k1, k2, kw, kb, kx2 = jax.random.split(key, 6)

    in_feats, out_feats = 128, 8

    # Deterministic parameters (nn.Linear parameter shapes).
    w_attn1 = jax.random.normal(k1, (1, in_feats), dtype=jnp.float32) * 0.1
    w_attn2 = jax.random.normal(k2, (1, in_feats), dtype=jnp.float32) * 0.1
    w_linear = jax.random.normal(kw, (out_feats, in_feats), dtype=jnp.float32) * 0.1
    b_linear = jax.random.normal(kb, (out_feats,), dtype=jnp.float32) * 0.1

    fwd = jax.jit(attn_model_forward, static_argnames=("tile_rows",))

    # Case 1: small batch, single tile.
    N = 8
    x = jax.random.normal(kx, (N, 2 * in_feats), dtype=jnp.float32)
    logp, emb = fwd(x, w_attn1, w_attn2, w_linear, b_linear)
    jax.block_until_ready((logp, emb))
    logp_ref, emb_ref = reference_forward(x, w_attn1, w_attn2, w_linear, b_linear)
    assert jnp.allclose(logp, logp_ref, atol=1e-5, rtol=1e-5), "log_softmax mismatch"
    assert jnp.allclose(emb, emb_ref, atol=1e-5, rtol=1e-5), "embeddings mismatch"

    # Case 2: batch not divisible by the tile -> exercises the (un-padded)
    # partial last block with masked output stores.
    N2 = 40
    x2 = jax.random.normal(kx2, (N2, 2 * in_feats), dtype=jnp.float32)
    logp2, emb2 = fwd(x2, w_attn1, w_attn2, w_linear, b_linear, tile_rows=16)
    jax.block_until_ready((logp2, emb2))
    logp2_ref, emb2_ref = reference_forward(x2, w_attn1, w_attn2, w_linear, b_linear)
    assert jnp.allclose(logp2, logp2_ref, atol=1e-5, rtol=1e-5), "tiled log_softmax mismatch"
    assert jnp.allclose(emb2, emb2_ref, atol=1e-5, rtol=1e-5), "tiled embeddings mismatch"

    print("KERNEL_OK")
</pallas_src>

<mosaic_0001>
module attributes {stable_mosaic.version = 11 : i64} {
  func.func @attn_model_kernel(%arg0: i32, %arg1: memref<8x256xf32, #tpu.memory_space<vmem>>, %arg2: memref<256x1xf32, #tpu.memory_space<vmem>>, %arg3: memref<128x8xf32, #tpu.memory_space<vmem>>, %arg4: memref<1x8xf32, #tpu.memory_space<vmem>>, %arg5: memref<8x8xf32, #tpu.memory_space<vmem>>, %arg6: memref<8x128xf32, #tpu.memory_space<vmem>>) attributes {dimension_semantics = [#tpu.dimension_semantics<parallel>], iteration_bounds = array<i64: 1>, scalar_prefetch = 0 : i64, scratch_operands = 0 : i64, tpu.core_type = #tpu.core_type<tc>, window_params = [{transform_indices = @transform_0, window_bounds = array<i64: 8, 256>}, {pipeline_mode = #tpu.pipeline_mode<synchronous>, transform_indices = @transform_1, window_bounds = array<i64: 256, 1>}, {pipeline_mode = #tpu.pipeline_mode<synchronous>, transform_indices = @transform_2, window_bounds = array<i64: 128, 8>}, {pipeline_mode = #tpu.pipeline_mode<synchronous>, transform_indices = @transform_3, window_bounds = array<i64: 1, 8>}, {transform_indices = @transform_4, window_bounds = array<i64: 8, 8>}, {transform_indices = @transform_5, window_bounds = array<i64: 8, 128>}]} {
    %c0 = arith.constant 0 : index
    %c0_0 = arith.constant 0 : index
    %0 = vector.load %arg1[%c0, %c0_0] : memref<8x256xf32, #tpu.memory_space<vmem>>, vector<8x256xf32>
    %1 = vector.extract_strided_slice %0 {offsets = [0, 0], sizes = [8, 128], strides = [1, 1]} : vector<8x256xf32> to vector<8x128xf32>
    %2 = vector.extract_strided_slice %0 {offsets = [0, 128], sizes = [8, 128], strides = [1, 1]} : vector<8x256xf32> to vector<8x128xf32>
    %c0_1 = arith.constant 0 : index
    %c0_2 = arith.constant 0 : index
    %3 = vector.load %arg2[%c0_1, %c0_2] : memref<256x1xf32, #tpu.memory_space<vmem>>, vector<256x1xf32>
    %cst = arith.constant dense<0.000000e+00> : vector<8x1xf32>
    %4 = tpu.matmul %0, %3, %cst {dimension_numbers = #tpu.dot_dimension_numbers<[1], [0], [0], [1], [0, 0, 1, 1], [], []>} : vector<8x256xf32>, vector<256x1xf32>, vector<8x1xf32> -> vector<8x1xf32>
    %cst_3 = arith.constant 5.000000e-01 : f32
    %5 = vector.broadcast %cst_3 : f32 to vector<8x1xf32>
    %6 = arith.mulf %5, %4 : vector<8x1xf32>
    %7 = math.tanh %6 : vector<8x1xf32>
    %cst_4 = arith.constant 1.000000e+00 : f32
    %8 = vector.broadcast %cst_4 : f32 to vector<8x1xf32>
    %9 = arith.addf %8, %7 : vector<8x1xf32>
    %cst_5 = arith.constant 5.000000e-01 : f32
    %10 = vector.broadcast %cst_5 : f32 to vector<8x1xf32>
    %11 = arith.mulf %10, %9 : vector<8x1xf32>
    %12 = arith.subf %1, %2 : vector<8x128xf32>
    %13 = vector.broadcast %11 : vector<8x1xf32> to vector<8x128xf32>
    %14 = arith.mulf %13, %12 : vector<8x128xf32>
    %15 = arith.addf %2, %14 : vector<8x128xf32>
    %c0_6 = arith.constant 0 : index
    %c0_7 = arith.constant 0 : index
    %16 = vector.load %arg6[%c0_6, %c0_7] : memref<8x128xf32, #tpu.memory_space<vmem>>, vector<8x128xf32>
    tpu.vector_store %arg6[%c0_6, %c0_7], %15 {strides = array<i32>} : memref<8x128xf32, #tpu.memory_space<vmem>>, vector<8x128xf32>,
    %c0_8 = arith.constant 0 : index
    %c0_9 = arith.constant 0 : index
    %17 = vector.load %arg3[%c0_8, %c0_9] : memref<128x8xf32, #tpu.memory_space<vmem>>, vector<128x8xf32>
    %cst_10 = arith.constant dense<0.000000e+00> : vector<8x8xf32>
    %18 = tpu.matmul %15, %17, %cst_10 {dimension_numbers = #tpu.dot_dimension_numbers<[1], [0], [0], [1], [0, 0, 1, 1], [], []>} : vector<8x128xf32>, vector<128x8xf32>, vector<8x8xf32> -> vector<8x8xf32>
    %c0_11 = arith.constant 0 : index
    %c0_12 = arith.constant 0 : index
    %19 = vector.load %arg4[%c0_11, %c0_12] : memref<1x8xf32, #tpu.memory_space<vmem>>, vector<1x8xf32>
    %20 = vector.broadcast %19 : vector<1x8xf32> to vector<8x8xf32>
    %21 = arith.addf %18, %20 : vector<8x8xf32>
    %cst_13 = arith.constant dense<0xFF800000> : vector<8xf32>
    %22 = vector.multi_reduction <maximumf>, %21, %cst_13 [1] : vector<8x8xf32> to vector<8xf32>
    %23 = vector.shape_cast %22 : vector<8xf32> to vector<8x1xf32>
    %24 = vector.broadcast %23 : vector<8x1xf32> to vector<8x8xf32>
    %25 = arith.subf %21, %24 : vector<8x8xf32>
    %26 = math.exp %25 : vector<8x8xf32>
    %cst_14 = arith.constant dense<0.000000e+00> : vector<8xf32>
    %27 = vector.multi_reduction <add>, %26, %cst_14 [1] : vector<8x8xf32> to vector<8xf32>
    %28 = vector.shape_cast %27 : vector<8xf32> to vector<8x1xf32>
    %29 = math.log %28 : vector<8x1xf32>
    %30 = vector.broadcast %29 : vector<8x1xf32> to vector<8x8xf32>
    %31 = arith.subf %25, %30 : vector<8x8xf32>
    %c0_15 = arith.constant 0 : index
    %c0_16 = arith.constant 0 : index
    %32 = vector.load %arg5[%c0_15, %c0_16] : memref<8x8xf32, #tpu.memory_space<vmem>>, vector<8x8xf32>
    tpu.vector_store %arg5[%c0_15, %c0_16], %31 {strides = array<i32>} : memref<8x8xf32, #tpu.memory_space<vmem>>, vector<8x8xf32>,
    return
  }
  func.func @transform_0(%arg0: i32) -> (i32, i32) {
    %c0_i32 = arith.constant 0 : i32
    %c0_i32_0 = arith.constant 0 : i32
    return %arg0, %c0_i32 : i32, i32
  }
  func.func @transform_1(%arg0: i32) -> (i32, i32) {
    %c0_i32 = arith.constant 0 : i32
    %c0_i32_0 = arith.constant 0 : i32
    %c0_i32_1 = arith.constant 0 : i32
    return %c0_i32, %c0_i32_0 : i32, i32
  }
  func.func @transform_2(%arg0: i32) -> (i32, i32) {
    %c0_i32 = arith.constant 0 : i32
    %c0_i32_0 = arith.constant 0 : i32
    %c0_i32_1 = arith.constant 0 : i32
    return %c0_i32, %c0_i32_0 : i32, i32
  }
  func.func @transform_3(%arg0: i32) -> (i32, i32) {
    %c0_i32 = arith.constant 0 : i32
    %c0_i32_0 = arith.constant 0 : i32
    %c0_i32_1 = arith.constant 0 : i32
    return %c0_i32, %c0_i32_0 : i32, i32
  }
  func.func @transform_4(%arg0: i32) -> (i32, i32) {
    %c0_i32 = arith.constant 0 : i32
    %c0_i32_0 = arith.constant 0 : i32
    return %arg0, %c0_i32 : i32, i32
  }
  func.func @transform_5(%arg0: i32) -> (i32, i32) {
    %c0_i32 = arith.constant 0 : i32
    %c0_i32_0 = arith.constant 0 : i32
    return %arg0, %c0_i32 : i32, i32
  }
}

</mosaic_0001>

<bundles_post_ra>
// kernel: attn_model_forward.1
= control target key start
LH: loop header
LB: loop body
LE: loop exit
PB: predicated region body
PF: predicated region fallthrough
CT: control target
= control target key end

     0   :  { %11 = vsyncpa [#allocation3], 0  ;;  %s699_s0 = inlined_call_operand.vmem [shape: f32[8,256], index: 0, kind: input, shape index: {}]   ;;  %s700_s1 = inlined_call_operand.vmem [shape: f32[256,1], index: 1, kind: input, shape index: {}]   ;;  %s701_s2 = inlined_call_operand.vmem [shape: f32[128,8], index: 2, kind: input, shape index: {}]   ;;  %s702_s3 = inlined_call_operand.vmem [shape: f32[1,8], index: 3, kind: input, shape index: {}]   ;;  %s703_s4 = inlined_call_operand.hbm [shape: f32[8,8], index: 4, kind: output, shape index: {0}]   ;;  %s704_s5 = inlined_call_operand.hbm [shape: f32[8,128], index: 5, kind: output, shape index: {1}]  }
   0x1   :  { %v39_v0 = vld [vmem:[%s700_s1 + $0x80] sm:$0xff]  ;;  %v40_v1 = vld [vmem:[%s700_s1 + $0x88] sm:$0xff]  ;;  %v41_v5 = vld [vmem:[%s700_s1 + $0x90] sm:$0xff] }
   0x2   :  { %v23_v2 = vld [vmem:[%s700_s1] sm:$0xff]  ;;  %v361_v3 = vpack.c.bf16 %v40_v1, %v39_v0  ;;  %v24_v4 = vld [vmem:[%s700_s1 + $0x8] sm:$0xff]  ;;  %v42_v6 = vld [vmem:[%s700_s1 + $0x98] sm:$0xff] }
   0x3   :  { %v363_v7 = vpack.c.bf16 %v24_v4, %v23_v2  ;;  %v365_v8 = vpack.c.bf16 %v42_v6, %v41_v5  ;;  %v25_v9 = vld [vmem:[%s700_s1 + $0x10] sm:$0xff]  ;;  %v26_v10 = vld [vmem:[%s700_s1 + $0x18] sm:$0xff]  ;;  %v43_v11 = vld [vmem:[%s700_s1 + $0xa0] sm:$0xff] }
   0x4   :  { %362 = vmatprep.subr.bf16.mxu0 %v361_v3  ;;  %v44_v12 = vld [vmem:[%s700_s1 + $0xa8] sm:$0xff]  ;;  %v367_v13 = vpack.c.bf16 %v26_v10, %v25_v9  ;;  %v27_v15 = vld [vmem:[%s700_s1 + $0x20] sm:$0xff]  ;;  %v45_v17 = vld [vmem:[%s700_s1 + $0xb0] sm:$0xff] }
   0x5   :  { %364 = vmatpush3.bf16.msra.mxu0 %v363_v7  ;;  %v369_v14 = vpack.c.bf16 %v44_v12, %v43_v11  ;;  %v28_v16 = vld [vmem:[%s700_s1 + $0x28] sm:$0xff]  ;;  %v46_v18 = vld [vmem:[%s700_s1 + $0xb8] sm:$0xff]  ;;  %v29_v21 = vld [vmem:[%s700_s1 + $0x30] sm:$0xff] }
   0x6   :  { %366 = vmatprep.subr.bf16.mxu0 %v365_v8  ;;  %v371_v19 = vpack.c.bf16 %v28_v16, %v27_v15  ;;  %v373_v20 = vpack.c.bf16 %v46_v18, %v45_v17  ;;  %v30_v22 = vld [vmem:[%s700_s1 + $0x38] sm:$0xff]  ;;  %v47_v23 = vld [vmem:[%s700_s1 + $0xc0] sm:$0xff]  ;;  %v48_v24 = vld [vmem:[%s700_s1 + $0xc8] sm:$0xff] }
   0x7   :  { %v571_v25 = vld [vmem:[%s699_s0 + $0x8] sm:$0xff] }
   0x8   :  { %119 = vmatprep.mubr.f32.mxu0 %v571_v25 }
   0x9   :  { %368 = vmatpush3.bf16.msra.mxu0 %v367_v13 }
   0xa   :  { %370 = vmatprep.subr.bf16.mxu0 %v369_v14 }
   0xb   :  { %12 = vsyncpa [#allocation5], 0  ;;  %v375_v26 = vpack.c.bf16 %v30_v22, %v29_v21  ;;  %v377_v27 = vpack.c.bf16 %v48_v24, %v47_v23  ;;  %v31_v28 = vld [vmem:[%s700_s1 + $0x40] sm:$0xff]  ;;  %v32_v29 = vld [vmem:[%s700_s1 + $0x48] sm:$0xff]  ;;  %v478_v50 = vmov 0   ;;  %v479_v54 = vmov 0.0|0.0  }
   0xc   :  { %v49_v30 = vld [vmem:[%s700_s1 + $0xd0] sm:$0xff]  ;;  %v50_v31 = vld [vmem:[%s700_s1 + $0xd8] sm:$0xff]  ;;  %v379_v32 = vpack.c.bf16 %v32_v29, %v31_v28  ;;  %v51_v36 = vld [vmem:[%s700_s1 + $0xe0] sm:$0xff]  ;;  %423 = vset.pattern.permute.xlu0 %v478_v50  ;;  %393 = vmatprep.subr.bf16.mxu1 %v479_v54  ;;  %vm480_vm0 = vmmov 0   ;;  %vm231_vm1 = vcmask 64512  }
   0xd   :  { %372 = vmatpush3.bf16.msra.mxu0 %v371_v19  ;;  %v381_v33 = vpack.c.bf16 %v50_v31, %v49_v30  ;;  %v33_v34 = vld [vmem:[%s700_s1 + $0x50] sm:$0xff]  ;;  %v34_v35 = vld [vmem:[%s700_s1 + $0x58] sm:$0xff]  ;;  %v52_v37 = vld [vmem:[%s700_s1 + $0xe8] sm:$0xff]  ;;  %v481_v19 = vmov 0.0  }
   0xe   :  { %374 = vmatprep.subr.bf16.mxu0 %v373_v20  ;;  %v383_v38 = vpack.c.bf16 %v34_v35, %v33_v34  ;;  %v385_v39 = vpack.c.bf16 %v52_v37, %v51_v36  ;;  %v35_v40 = vld [vmem:[%s700_s1 + $0x60] sm:$0xff]  ;;  %v36_v41 = vld [vmem:[%s700_s1 + $0x68] sm:$0xff]  ;;  %v53_v42 = vld [vmem:[%s700_s1 + $0xf0] sm:$0xff]  ;;  %358 = vmatprep.mubr.msk.f32.mxu1 %vm480_vm0, %v481_v19 }
   0xf   :  { %v54_v43 = vld [vmem:[%s700_s1 + $0xf8] sm:$0xff]  ;;  %v387_v44 = vpack.c.bf16 %v36_v41, %v35_v40  ;;  %v37_v46 = vld [vmem:[%s700_s1 + $0x70] sm:$0xff]  ;;  %v21_v49 = vld [vmem:[%s699_s0] sm:$0xff] }
  0x10   :  { %v389_v45 = vpack.c.bf16 %v54_v43, %v53_v42  ;;  %v38_v47 = vld [vmem:[%s700_s1 + $0x78] sm:$0xff]  ;;  %v138_v51 = vld [vmem:[%s701_s2] sm:$0xff]  ;;  %v139_v52 = vld [vmem:[%s701_s2 + $0x8] sm:$0xff]  ;;  %v129_v20 = vsub.f32 %v21_v49, %v571_v25 }
  0x11   :  { %376 = vmatpush3.bf16.msra.mxu0 %v375_v26  ;;  %v391_v48 = vpack.c.bf16 %v38_v47, %v37_v46  ;;  %v140_v53 = vld [vmem:[%s701_s2 + $0x10] sm:$0xff]  ;;  %v394_v55 = vpack.c.bf16 %v139_v52, %v138_v51  ;;  %v141_v56 = vld [vmem:[%s701_s2 + $0x18] sm:$0xff]  ;;  %v142_v58 = vld [vmem:[%s701_s2 + $0x20] sm:$0xff] }
  0x12   :  { %378 = vmatprep.subr.bf16.mxu0 %v377_v27  ;;  %v397_v57 = vpack.c.bf16 %v141_v56, %v140_v53  ;;  %v143_v59 = vld [vmem:[%s701_s2 + $0x28] sm:$0xff]  ;;  %v144_v61 = vld [vmem:[%s701_s2 + $0x30] sm:$0xff]  ;;  %v145_v62 = vld [vmem:[%s701_s2 + $0x38] sm:$0xff] }
  0x13   :  { %395 = vmatpush3.bf16.msra.mxu1 %v394_v55  ;;  %v400_v60 = vpack.c.bf16 %v143_v59, %v142_v58  ;;  %v403_v63 = vpack.c.bf16 %v145_v62, %v144_v61  ;;  %v146_v0 = vld [vmem:[%s701_s2 + $0x40] sm:$0xff]  ;;  %v147_v1 = vld [vmem:[%s701_s2 + $0x48] sm:$0xff]  ;;  %v148_v3 = vld [vmem:[%s701_s2 + $0x50] sm:$0xff] }
  0x14   :  { %396 = vmatprep.subr.bf16.mxu1 %v479_v54  ;;  %v406_v2 = vpack.c.bf16 %v147_v1, %v146_v0  ;;  %v149_v4 = vld [vmem:[%s701_s2 + $0x58] sm:$0xff]  ;;  %v150_v6 = vld [vmem:[%s701_s2 + $0x60] sm:$0xff]  ;;  %v151_v7 = vld [vmem:[%s701_s2 + $0x68] sm:$0xff] }
  0x15   :  { %380 = vmatpush3.bf16.msra.mxu0 %v379_v32  ;;  %v409_v5 = vpack.c.bf16 %v149_v4, %v148_v3  ;;  %v412_v8 = vpack.c.bf16 %v151_v7, %v150_v6  ;;  %v152_v16 = vld [vmem:[%s701_s2 + $0x70] sm:$0xff]  ;;  %v153_v17 = vld [vmem:[%s701_s2 + $0x78] sm:$0xff]  ;;  %v273_v24 = vld [vmem:[%s702_s3] ss:$0 sm:$0xff]  ;;  %s482_s2 = smov [#allocation4]  }
  0x16   :  { %382 = vmatprep.subr.bf16.mxu0 %v381_v33  ;;  %v415_v18 = vpack.c.bf16 %v153_v17, %v152_v16  ;;  %s261_s0 = sshll.u32 %s482_s2, 4  ;;  %s262_s0 = int_to_ptr.vmem [resolvable:$true] %s261_s0 }
  0x17   :  { %398 = vmatpush3.bf16.msra.mxu1 %v397_v57  ;;  %s430_s17 = scalar_lea.vmem %s262_s0, 128  ;;  %p435_p1 = scmp.lt.s32.totalorder %s262_s0, %s262_s0 }
  0x18   :  { %399 = vmatprep.subr.bf16.mxu1 %v479_v54  ;;  %p431_p0 = scmp.ne.s32.totalorder %s262_s0, %s430_s17  ;;  %p436_p2 = scmp.lt.s32.totalorder %s430_s17, %s430_s17 }
  0x19   :  { %384 = vmatpush3.bf16.msra.mxu0 %v383_v38 }
  0x1a   :  { %386 = vmatprep.subr.bf16.mxu0 %v385_v39  ;;  %p437_p3 = por %p436_p2, %p435_p1 }
  0x1b   :  { %401 = vmatpush3.bf16.msra.mxu1 %v400_v60 }
  0x1c   :  { %402 = vmatprep.subr.bf16.mxu1 %v479_v54  ;;  %p438_p4 = pnand %p437_p3, %p431_p0 }
  0x1d   :  { %388 = vmatpush3.bf16.msra.mxu0 %v387_v44 }
  0x1e   :  { %390 = vmatprep.subr.bf16.mxu0 %v389_v45 }
  0x1f   :  { %404 = vmatpush3.bf16.msra.mxu1 %v403_v63 }
  0x20   :  { %405 = vmatprep.subr.bf16.mxu1 %v479_v54 }
  0x21   :  { %392 = vmatpush3.bf16.msra.mxu0 %v391_v48 }
  0x23   :  { %407 = vmatpush3.bf16.msra.mxu1 %v406_v2 }
  0x24   :  { %120 = vmatmul.mubr.f32.vlgmr.msra.gmra.mrb[0].mxu0 %v21_v49  ;;  %408 = vmatprep.subr.bf16.mxu1 %v479_v54 }
  0x27   :  { %410 = vmatpush3.bf16.msra.mxu1 %v409_v5 }
  0x28   :  { %411 = vmatprep.subr.bf16.mxu1 %v479_v54 }
  0x2b   :  { %413 = vmatpush3.bf16.msra.mxu1 %v412_v8 }
  0x2c   :  { %414 = vmatprep.subr.bf16.mxu1 %v479_v54 }
  0x2f   :  { %416 = vmatpush3.bf16.msra.mxu1 %v415_v18 }
  0xf7   :  { %v306_v9 = vpop.f32.mrb[0].mxu0 }
  0xf8   :  { %v307_v10 = vpop.f32.mrb[1].mxu0 }
  0xf9   :  { %v308_v11 = vadd.f32 %v307_v10, %v306_v9 }
  0xfb   :  { %v125_v12 = vmul.f32 0.5, %v308_v11 }
  0xfd   :  { %424 = vtanh.f32 %v125_v12 }
 0x107   :  { %v425_v13 = vpop.eup %424 }
 0x108   :  { %v127_v14 = vadd.f32 1.0, %v425_v13 }
 0x10a   :  { %v128_v15 = vmul.f32 0.5, %v127_v14 }
 0x10c   :  { %132 = vperm.xlu0 %423, %v128_v15  }
 0x18b   :  { %v133_v21 = vpop.permute.xlu0 %132 }
 0x18c   :  { %v135_v22 = vmul.f32 %v133_v21, %v129_v20 }
 0x18e   :  { %v136_v23 = vadd.f32 %v135_v22, %v571_v25 }
 0x190   :  { %137 = vst [vmem:[#allocation4] sm:$0xff] %v136_v23  ;;  %359 = vmatmul.mubr.f32.vlgmr.msra.gmra.mrb[0].mxu1 %v136_v23 }
 0x263   :  { %v227_v26 = vpop.f32.mrb[0].mxu1 }
 0x264   :  { %v228_v27 = vadd.f32 %v273_v24, %v227_v26  ;;  %v360_v28 = vpop.f32.mrb[1].mxu1 }
 0x266   :  { %v232_v29 = vsel %vm231_vm1, %v228_v27, -inf }
 0x267   :  { %233 = vmax.xlane.f32.xlu0 %v232_v29 }
 0x2f4   :  { %v234_v30 = vpop.xlane.xlu0 %233 }
 0x2f5   :  { %v235_v31 = vsub.f32 %v228_v27, %v234_v30 }
 0x2f7   :  { %v236_v32 = vmul.f32 1.442695, %v235_v31 }
 0x2f9   :  { %426 = vpow2.f32 %v236_v32 }
 0x303   :  { %v427_v33 = vpop.eup %426 }
 0x304   :  { %v238_v25 = vsel %vm231_vm1, %v427_v33, 0.0 }
 0x305   :  { %239 = vadd.xlane.f32.xlu1 %v238_v25 }
 0x306   :  { %441 = shalt.err (!%p438_p4)
}
 0x307   :  { %s442_s19 = scalar_lea.hbm %s704_s5, 128 }
 0x308   :  { %p443_p5 = scmp.ne.s32.totalorder %s704_s5, %s442_s19  ;;  %p446_p6 = scmp.lt.u32.totalorder %s442_s19, %s704_s5 }
 0x30a   :  { %p448_p7 = pnand %p446_p6, %p443_p5 }
 0x30c   :  { %451 = shalt.err (!%p448_p7)
}
 0x30d   :  { %264 = dma.vmem_to_hbm [thread:$0]  %s262_s0, 128, %s704_s5, [#allocation5]  }
 0x30e   :  { %s483_s26 = smov [#allocation2]  }
 0x30f   :  { %s251_s27 = sshll.u32 %s483_s26, 4  ;;  %s252_s27 = int_to_ptr.vmem [resolvable:$true] %s251_s27 }
 0x310   :  { %s452_s28 = scalar_lea.vmem %s252_s27, 128  ;;  %p457_p9 = scmp.lt.s32.totalorder %s252_s27, %s252_s27 }
 0x311   :  { %p453_p8 = scmp.ne.s32.totalorder %s252_s27, %s452_s28  ;;  %p458_p10 = scmp.lt.s32.totalorder %s452_s28, %s452_s28 }
 0x313   :  { %p459_p11 = por %p458_p10, %p457_p9 }
 0x315   :  { %p460_p12 = pnand %p459_p11, %p453_p8 }
 0x392   :  { %v240_v34 = vpop.xlane.xlu1 %239 }
 0x393   :  { %428 = vlog2.f32 %v240_v34 }
 0x39d   :  { %v429_v35 = vpop.eup %428 }
 0x39e   :  { %v242_v36 = vmul.f32 0.6931472, %v429_v35 }
 0x3a0   :  { %v243_v37 = vsub.f32 %v235_v31, %v242_v36 }
 0x3a2   :  { %244 = vst.msk [vmem:[#allocation2] sm:$0xff] %vm231_vm1, %v243_v37 }
 0x3a3   :  { %463 = shalt.err (!%p460_p12)
}
 0x3a4   :  { %s464_s5 = scalar_lea.hbm %s703_s4, 128 }
 0x3a5   :  { %p465_p13 = scmp.ne.s32.totalorder %s703_s4, %s464_s5  ;;  %p468_p0 = scmp.lt.u32.totalorder %s464_s5, %s703_s4 }
 0x3a7   :  { %p470_p1 = pnand %p468_p0, %p465_p13 }
 0x3a9   :  { %473 = shalt.err (!%p470_p1)
}
 0x3aa   :  { %254 = dma.vmem_to_hbm [thread:$0]  %s252_s27, 128, %s703_s4, [#allocation3]  }
 0x3ab   :  { %474 = dma.done.wait [#allocation3], 128  }
 0x3ac   :  { %475 = vsyncadd [#allocation3], 4294967168 }
 0x3ad   :  { %476 = dma.done.wait [#allocation5], 128  }
 0x3ae   :  { %477 = vsyncadd [#allocation5], 4294967168 }
 0x3af   :  { %271 = vsyncpa [#allocation3], 1 }
 0x3b0   :  { %272 = vsyncpa [#allocation5], 1 }

</bundles_post_ra>
